<compile_context>
chip_gen: v6e
topology: v6e:2x2x1
jax: 0.10.0
libtpu: 0.0.40
codegen_flags: <defaults>
</compile_context>

<pallas_src>
import functools

import jax
import jax.numpy as jnp
from jax import lax
from jax.experimental import pallas as pl
from jax.experimental.pallas import tpu as pltpu

LANE = 128


def _round_up(v, m):
    return ((v + m - 1) // m) * m


def _largest_divisor(n_total, cap, multiple):
    """Largest multiple of `multiple` that divides `n_total` and is <= cap."""
    cap = max(multiple, min(cap, n_total))
    cap = (cap // multiple) * multiple
    for t in range(cap, 0, -multiple):
        if n_total % t == 0:
            return t
    return multiple


def _vmem_bytes_estimate(n_pad, f_pad, e_pad, tile_n, tile_k,
                         adj_itemsize, mxu_itemsize, x_resident):
    x_rows = n_pad if x_resident else tile_k
    return (2 * tile_n * tile_k * adj_itemsize        # adj tiles (double buffered)
            + 2 * x_rows * f_pad * mxu_itemsize       # x K-tiles / resident x
            + 2 * tile_n * f_pad * mxu_itemsize       # x self rows
            + 2 * 2 * f_pad * e_pad * mxu_itemsize    # stacked weight
            + 2 * tile_n * e_pad * 4                  # f32 output block
            + tile_n * f_pad * 4                      # f32 accumulator
            + tile_n * 2 * f_pad * mxu_itemsize)      # combined epilogue scratch


def gs_block_kernel(xk_ref, xs_ref, adj_ref, w_ref, out_ref,
                    acc_ref, comb_ref, *, feat_dim, x_resident):
    """Grid = (row blocks i [parallel], reduction blocks k over neighbors).

    xk_ref  : (Npad, Fp) resident x  OR  (TK, Fp) streamed K-tile (MXU dtype).
              Column `feat_dim` is all-ones (degrees come out of the MXU).
    xs_ref  : (TN, Fp)  self rows of this output block (MXU dtype).
    adj_ref : (TN, TK)  adjacency tile (int8 / fp8 / f32; 0/1 values).
    w_ref   : (2*Fp, Ep) stacked [W1.T ; W2.T], zero padded (MXU dtype).
    out_ref : (TN, Ep)  float32 output block, written at the last k step.
    acc_ref : (TN, Fp)  float32 accumulator for adj @ x_aug.
    comb_ref: (TN, 2*Fp) MXU-dtype scratch for the fused epilogue matmul.
    """
    k = pl.program_id(1)
    nk = pl.num_programs(1)

    @pl.when(k == 0)
    def _():
        acc_ref[...] = jnp.zeros_like(acc_ref)

    mxu_dtype = xs_ref.dtype
    adj_blk = adj_ref[...]                              # (TN, TK)
    if adj_blk.dtype != mxu_dtype:
        # int8 / fp8 HBM storage -> widen per tile (hides under DMA / MXU).
        adj_blk = adj_blk.astype(mxu_dtype)

    if x_resident:
        tile_k = adj_ref.shape[1]
        start = pl.multiple_of(k * tile_k, tile_k)
        xk = xk_ref[pl.ds(start, tile_k), :]            # slice of resident x
    else:
        xk = xk_ref[...]                                # streamed K-tile

    # adj @ [x | 1]: column `feat_dim` of the accumulator is rowsum(adj).
    acc_ref[...] += jnp.dot(adj_blk, xk, preferred_element_type=jnp.float32)

    @pl.when(k == nk - 1)
    def _():
        f_pad = xs_ref.shape[1]
        x_self = xs_ref[...]                            # (TN, Fp), col F == 1
        diff = acc_ref[...] - x_self.astype(jnp.float32)   # (adj - I) @ [x | 1]
        # diff[:, F] = rowsum(adj) - 1 = number of (non-self) neighbors.
        num_neigh = diff[:, feat_dim:feat_dim + 1]      # (TN, 1)
        # NOTE: matches PyTorch — isolated nodes (0 neighbors) divide by zero.
        neigh = diff * (1.0 / num_neigh)                # (TN, Fp)

        # relu(W @ [x ; neigh].T).T as ONE MXU pass with 2*Fp contraction:
        # rows [F:Fp) and [Fp+F:2Fp) of w_ref are zero, so the ones column and
        # feature padding contribute nothing.
        comb_ref[:, :f_pad] = x_self
        comb_ref[:, f_pad:] = neigh.astype(comb_ref.dtype)
        h = jnp.dot(comb_ref[...], w_ref[...],
                    preferred_element_type=jnp.float32)
        h = jnp.maximum(h, 0.0)

        # F.normalize(h, p=2, dim=1, eps=1e-12); padded E columns are exactly 0.
        ss = jnp.sum(h * h, axis=1, keepdims=True)
        inv_norm = lax.rsqrt(jnp.maximum(ss, 1e-24))    # EUP slot
        out_ref[...] = (h * inv_norm).astype(out_ref.dtype)


def gs_block_forward(x, adj, weight, *, tile_n=512, tile_k=2048,
                     mxu_dtype=jnp.bfloat16, adj_dtype=jnp.int8,
                     x_resident=None):
    """x: (N, F) f32, adj: (N, N) 0/1, weight: (E, 2F) f32 -> (N, E) f32.

    tile_n    : output row block (temporal M dim; bigger = less x/step overhead).
    tile_k    : reduction tile over the N neighbor axis (multiple of 128).
    mxu_dtype : MXU operand dtype (bf16 default, f32 accumulation; pass
                jnp.float32 for exact compute).
    adj_dtype : HBM storage dtype of the adjacency stream (int8 default —
                exact for 0/1; use jnp.float8_e4m3fn on v7x, jnp.float32 or
                None (= keep adj.dtype) to skip the one-time conversion).
    x_resident: force/disable keeping the whole feature matrix in VMEM
                (None = auto, resident when the padded x is <= 4 MiB).
    """
    x = jnp.asarray(x, jnp.float32)
    adj = jnp.asarray(adj)
    weight = jnp.asarray(weight, jnp.float32)
    n, f = x.shape
    e = weight.shape[0]
    assert adj.shape == (n, n)
    assert weight.shape == (e, 2 * f)

    # Lane padding. Reserve at least one spare padded column (lane index `f`)
    # that is set to 1.0 so adj @ x_aug yields the adjacency row sums on the
    # MXU for free (no per-tile VPU cast / XLU reduce, no row-sum scratch).
    f_pad = _round_up(f + 1, LANE)
    e_pad = _round_up(e, LANE)
    n_pad = _round_up(n, LANE)

    # Tile selection: multiples of 128 (lanes) / 32 (int8 sublane tiling) that
    # divide the padded node count, as large as requested.
    tile_k = _largest_divisor(n_pad, tile_k, LANE)
    tile_n = _largest_divisor(n_pad, tile_n, 32)
    # Keep >= 2 row blocks when possible so the "parallel" axis can split
    # across the 2 TensorCores of a v7x chip.
    if n_pad // tile_n < 2 and n_pad >= 64:
        tile_n = _largest_divisor(n_pad, n_pad // 2, 32)

    if adj_dtype is None:
        adj_dtype = adj.dtype
    adj_dtype = jnp.dtype(adj_dtype)
    mxu_bytes = jnp.dtype(mxu_dtype).itemsize

    # Keep the whole (padded) feature matrix VMEM-resident when it is small:
    # x is then fetched from HBM exactly once instead of once per row block.
    if x_resident is None:
        x_resident = n_pad * f_pad * mxu_bytes <= 4 * 1024 * 1024

    # --- padded operands (padded adjacency rows/cols are exactly zero, so
    # degrees and the self-subtraction stay correct for real rows) ----------
    x_p = (jnp.zeros((n_pad, f_pad), jnp.float32)
           .at[:n, :f].set(x)
           .at[:, f].set(1.0)                 # ones column -> degrees via MXU
           .astype(mxu_dtype))
    if adj.shape == (n_pad, n_pad) and adj.dtype == adj_dtype:
        adj_c = adj                           # already stored compact, no pass
    else:
        adj_c = (jnp.zeros((n_pad, n_pad), adj_dtype)
                 .at[:n, :n].set(adj.astype(adj_dtype)))
    # Stacked weight [W1.T ; W2.T] for the single fused epilogue matmul.
    w_cat = (jnp.zeros((2 * f_pad, e_pad), jnp.float32)
             .at[:f, :e].set(weight[:, :f].T)
             .at[f_pad:f_pad + f, :e].set(weight[:, f:].T)
             .astype(mxu_dtype))

    if x_resident:
        xk_spec = pl.BlockSpec((n_pad, f_pad), lambda i, k: (0, 0))
    else:
        xk_spec = pl.BlockSpec((tile_k, f_pad), lambda i, k: (k, 0))

    est = _vmem_bytes_estimate(n_pad, f_pad, e_pad, tile_n, tile_k,
                               adj_dtype.itemsize, mxu_bytes, x_resident)
    vmem_limit = int(min(48 << 20, max(16 << 20, 2 * est)))

    kernel = functools.partial(gs_block_kernel, feat_dim=f,
                               x_resident=x_resident)

    out_padded = pl.pallas_call(
        kernel,
        out_shape=jax.ShapeDtypeStruct((n_pad, e_pad), jnp.float32),
        grid_spec=pltpu.PrefetchScalarGridSpec(
            num_scalar_prefetch=0,
            grid=(n_pad // tile_n, n_pad // tile_k),
            in_specs=[
                xk_spec,                                              # x (K)
                pl.BlockSpec((tile_n, f_pad), lambda i, k: (i, 0)),   # x self
                pl.BlockSpec((tile_n, tile_k), lambda i, k: (i, k)),  # adj
                pl.BlockSpec((2 * f_pad, e_pad), lambda i, k: (0, 0)),  # W
            ],
            out_specs=pl.BlockSpec((tile_n, e_pad), lambda i, k: (i, 0)),
            scratch_shapes=[
                pltpu.VMEM((tile_n, f_pad), jnp.float32),     # adj@x accum
                pltpu.VMEM((tile_n, 2 * f_pad), mxu_dtype),   # [x ; neigh]
            ],
        ),
        compiler_params=pltpu.CompilerParams(
            dimension_semantics=("parallel", "arbitrary"),
            vmem_limit_bytes=vmem_limit,
        ),
    )(x_p, x_p, adj_c, w_cat)

    return out_padded[:n, :e]


def gs_block_reference(x, adj, weight):
    """Pure-JAX reference mirroring the PyTorch forward (mean, gcn=False)."""
    n = adj.shape[0]
    a = adj - jnp.eye(n, dtype=adj.dtype)
    mask = a / jnp.sum(a, axis=1, keepdims=True)
    neigh = mask @ x
    combined = jnp.concatenate([x, neigh], axis=1)
    h = jnp.maximum(weight @ combined.T, 0.0).T
    norm = jnp.sqrt(jnp.sum(h * h, axis=1, keepdims=True))
    return h / jnp.maximum(norm, 1e-12)


if __name__ == "__main__":
    N = 16          # number of nodes
    FEAT = 32       # feature_dim
    EMBED = 32      # embed_dim

    key = jax.random.PRNGKey(0)
    kx, kadj, kw = jax.random.split(key, 3)

    # node features
    x = jax.random.normal(kx, (N, FEAT), dtype=jnp.float32)

    # binary adjacency: ring graph + self loops + some random edges
    idx = jnp.arange(N)
    ring = (jnp.zeros((N, N), jnp.float32)
            .at[idx, (idx + 1) % N].set(1.0)
            .at[idx, (idx - 1) % N].set(1.0)
            .at[idx, idx].set(1.0))
    rand_edges = (jax.random.uniform(kadj, (N, N)) > 0.7).astype(jnp.float32)
    adj = jnp.maximum(ring, rand_edges)

    # xavier_uniform_ on weight (embed_dim, 2 * feat_dim)
    fan_in, fan_out = 2 * FEAT, EMBED
    bound = (6.0 / (fan_in + fan_out)) ** 0.5
    weight = jax.random.uniform(
        kw, (EMBED, 2 * FEAT), dtype=jnp.float32, minval=-bound, maxval=bound)

    ref = gs_block_reference(x, adj, weight)

    # Fast path: int8 adjacency stream, bf16 MXU operands, f32 accumulation.
    out_fast = gs_block_forward(x, adj, weight)
    out_fast = jax.block_until_ready(out_fast)
    assert out_fast.shape == (N, EMBED)
    assert jnp.allclose(out_fast, ref, atol=3e-2, rtol=3e-2), \
        "int8/bf16 kernel mismatch vs reference"

    # Exact path: float32 everywhere.
    out_f32 = gs_block_forward(x, adj, weight, mxu_dtype=jnp.float32,
                               adj_dtype=jnp.float32)
    out_f32 = jax.block_until_ready(out_f32)
    assert jnp.allclose(out_f32, ref, atol=1e-4, rtol=1e-4), \
        "f32 kernel mismatch vs reference"

    print("KERNEL_OK")
</pallas_src>

<mosaic_0001>
module attributes {stable_mosaic.version = 11 : i64} {
  func.func @gs_block_kernel(%arg0: i32, %arg1: i32, %arg2: memref<128x128xbf16, #tpu.memory_space<vmem>>, %arg3: memref<64x128xbf16, #tpu.memory_space<vmem>>, %arg4: memref<64x128xi8, #tpu.memory_space<vmem>>, %arg5: memref<256x128xbf16, #tpu.memory_space<vmem>>, %arg6: memref<64x128xf32, #tpu.memory_space<vmem>>, %arg7: memref<64x128xf32, #tpu.memory_space<vmem>>, %arg8: memref<64x256xbf16, #tpu.memory_space<vmem>>) attributes {dimension_semantics = [#tpu.dimension_semantics<parallel>, #tpu.dimension_semantics<arbitrary>], iteration_bounds = array<i64: 2, 1>, scalar_prefetch = 0 : i64, scratch_operands = 2 : i64, tpu.core_type = #tpu.core_type<tc>, window_params = [{pipeline_mode = #tpu.pipeline_mode<synchronous>, transform_indices = @transform_0, window_bounds = array<i64: 128, 128>}, {transform_indices = @transform_1, window_bounds = array<i64: 64, 128>}, {transform_indices = @transform_2, window_bounds = array<i64: 64, 128>}, {pipeline_mode = #tpu.pipeline_mode<synchronous>, transform_indices = @transform_3, window_bounds = array<i64: 256, 128>}, {transform_indices = @transform_4, window_bounds = array<i64: 64, 128>}]} {
    %c0_i32 = arith.constant 0 : i32
    %0 = arith.cmpi eq, %arg1, %c0_i32 : i32
    %1 = arith.extui %0 : i1 to i32
    %c0_i32_0 = arith.constant 0 : i32
    %2 = arith.cmpi ne, %1, %c0_i32_0 : i32
    scf.if %2 {
      %cst_9 = arith.constant 0.000000e+00 : f32
      %16 = vector.broadcast %cst_9 : f32 to vector<64x128xf32>
      %c0_10 = arith.constant 0 : index
      %c0_11 = arith.constant 0 : index
      %17 = vector.load %arg7[%c0_10, %c0_11] : memref<64x128xf32, #tpu.memory_space<vmem>>, vector<64x128xf32>
      tpu.vector_store %arg7[%c0_10, %c0_11], %16 {strides = array<i32>} : memref<64x128xf32, #tpu.memory_space<vmem>>, vector<64x128xf32>,
    } else {
    }
    %c0 = arith.constant 0 : index
    %c0_1 = arith.constant 0 : index
    %3 = vector.load %arg4[%c0, %c0_1] : memref<64x128xi8, #tpu.memory_space<vmem>>, vector<64x128xi8>
    %4 = arith.sitofp %3 : vector<64x128xi8> to vector<64x128xbf16>
    %c128_i32 = arith.constant 128 : i32
    %5 = arith.muli %arg1, %c128_i32 : i32
    %6 = tpu.assume_multiple %5, 128 : i32
    %7 = arith.index_cast %6 : i32 to index
    %c0_2 = arith.constant 0 : index
    %8 = vector.load %arg2[%7, %c0_2] : memref<128x128xbf16, #tpu.memory_space<vmem>>, vector<128x128xbf16>
    %c0_3 = arith.constant 0 : index
    %c0_4 = arith.constant 0 : index
    %9 = vector.load %arg7[%c0_3, %c0_4] : memref<64x128xf32, #tpu.memory_space<vmem>>, vector<64x128xf32>
    %cst = arith.constant dense<0.000000e+00> : vector<64x128xf32>
    %10 = tpu.matmul %4, %8, %cst {dimension_numbers = #tpu.dot_dimension_numbers<[1], [0], [0], [1], [0, 0, 1, 1], [], []>} : vector<64x128xbf16>, vector<128x128xbf16>, vector<64x128xf32> -> vector<64x128xf32>
    %11 = arith.addf %9, %10 : vector<64x128xf32>
    %c0_5 = arith.constant 0 : index
    %c0_6 = arith.constant 0 : index
    %12 = vector.load %arg7[%c0_5, %c0_6] : memref<64x128xf32, #tpu.memory_space<vmem>>, vector<64x128xf32>
    tpu.vector_store %arg7[%c0_5, %c0_6], %11 {strides = array<i32>} : memref<64x128xf32, #tpu.memory_space<vmem>>, vector<64x128xf32>,
    %c0_i32_7 = arith.constant 0 : i32
    %13 = arith.cmpi eq, %arg1, %c0_i32_7 : i32
    %14 = arith.extui %13 : i1 to i32
    %c0_i32_8 = arith.constant 0 : i32
    %15 = arith.cmpi ne, %14, %c0_i32_8 : i32
    scf.if %15 {
      %c0_9 = arith.constant 0 : index
      %c0_10 = arith.constant 0 : index
      %16 = vector.load %arg3[%c0_9, %c0_10] : memref<64x128xbf16, #tpu.memory_space<vmem>>, vector<64x128xbf16>
      %c0_11 = arith.constant 0 : index
      %c0_12 = arith.constant 0 : index
      %17 = vector.load %arg7[%c0_11, %c0_12] : memref<64x128xf32, #tpu.memory_space<vmem>>, vector<64x128xf32>
      %18 = arith.extf %16 : vector<64x128xbf16> to vector<64x128xf32>
      %19 = arith.subf %17, %18 : vector<64x128xf32>
      %20 = vector.extract_strided_slice %19 {offsets = [0, 32], sizes = [64, 1], strides = [1, 1]} : vector<64x128xf32> to vector<64x1xf32>
      %cst_13 = arith.constant 1.000000e+00 : f32
      %21 = vector.broadcast %cst_13 : f32 to vector<64x1xf32>
      %22 = arith.divf %21, %20 : vector<64x1xf32>
      %23 = vector.broadcast %22 : vector<64x1xf32> to vector<64x128xf32>
      %24 = arith.mulf %19, %23 : vector<64x128xf32>
      %c0_14 = arith.constant 0 : index
      %c0_15 = arith.constant 0 : index
      %25 = vector.load %arg8[%c0_14, %c0_15] : memref<64x256xbf16, #tpu.memory_space<vmem>>, vector<64x128xbf16>
      tpu.vector_store %arg8[%c0_14, %c0_15], %16 {strides = array<i32>} : memref<64x256xbf16, #tpu.memory_space<vmem>>, vector<64x128xbf16>,
      %26 = arith.truncf %24 : vector<64x128xf32> to vector<64x128xbf16>
      %c0_16 = arith.constant 0 : index
      %c128 = arith.constant 128 : index
      %27 = vector.load %arg8[%c0_16, %c128] : memref<64x256xbf16, #tpu.memory_space<vmem>>, vector<64x128xbf16>
      tpu.vector_store %arg8[%c0_16, %c128], %26 {strides = array<i32>} : memref<64x256xbf16, #tpu.memory_space<vmem>>, vector<64x128xbf16>,
      %c0_17 = arith.constant 0 : index
      %c0_18 = arith.constant 0 : index
      %28 = vector.load %arg8[%c0_17, %c0_18] : memref<64x256xbf16, #tpu.memory_space<vmem>>, vector<64x256xbf16>
      %c0_19 = arith.constant 0 : index
      %c0_20 = arith.constant 0 : index
      %29 = vector.load %arg5[%c0_19, %c0_20] : memref<256x128xbf16, #tpu.memory_space<vmem>>, vector<256x128xbf16>
      %cst_21 = arith.constant dense<0.000000e+00> : vector<64x128xf32>
      %30 = tpu.matmul %28, %29, %cst_21 {dimension_numbers = #tpu.dot_dimension_numbers<[1], [0], [0], [1], [0, 0, 1, 1], [], []>} : vector<64x256xbf16>, vector<256x128xbf16>, vector<64x128xf32> -> vector<64x128xf32>
      %cst_22 = arith.constant 0.000000e+00 : f32
      %31 = vector.broadcast %cst_22 : f32 to vector<64x128xf32>
      %32 = arith.maximumf %30, %31 : vector<64x128xf32>
      %33 = arith.mulf %32, %32 : vector<64x128xf32>
      %cst_23 = arith.constant dense<0.000000e+00> : vector<64xf32>
      %34 = vector.multi_reduction <add>, %33, %cst_23 [1] : vector<64x128xf32> to vector<64xf32>
      %35 = vector.shape_cast %34 : vector<64xf32> to vector<64x1xf32>
      %cst_24 = arith.constant 1.000000e-24 : f32
      %36 = vector.broadcast %cst_24 : f32 to vector<64x1xf32>
      %37 = arith.maximumf %35, %36 : vector<64x1xf32>
      %38 = math.rsqrt %37 : vector<64x1xf32>
      %39 = vector.broadcast %38 : vector<64x1xf32> to vector<64x128xf32>
      %40 = arith.mulf %32, %39 : vector<64x128xf32>
      %c0_25 = arith.constant 0 : index
      %c0_26 = arith.constant 0 : index
      %41 = vector.load %arg6[%c0_25, %c0_26] : memref<64x128xf32, #tpu.memory_space<vmem>>, vector<64x128xf32>
      tpu.vector_store %arg6[%c0_25, %c0_26], %40 {strides = array<i32>} : memref<64x128xf32, #tpu.memory_space<vmem>>, vector<64x128xf32>,
    } else {
    }
    return
  }
  func.func @transform_0(%arg0: i32, %arg1: i32) -> (i32, i32) {
    %c0_i32 = arith.constant 0 : i32
    %c0_i32_0 = arith.constant 0 : i32
    %c0_i32_1 = arith.constant 0 : i32
    return %c0_i32, %c0_i32_0 : i32, i32
  }
  func.func @transform_1(%arg0: i32, %arg1: i32) -> (i32, i32) {
    %c0_i32 = arith.constant 0 : i32
    %c0_i32_0 = arith.constant 0 : i32
    return %arg0, %c0_i32 : i32, i32
  }
  func.func @transform_2(%arg0: i32, %arg1: i32) -> (i32, i32) {
    %c0_i32 = arith.constant 0 : i32
    return %arg0, %arg1 : i32, i32
  }
  func.func @transform_3(%arg0: i32, %arg1: i32) -> (i32, i32) {
    %c0_i32 = arith.constant 0 : i32
    %c0_i32_0 = arith.constant 0 : i32
    %c0_i32_1 = arith.constant 0 : i32
    return %c0_i32, %c0_i32_0 : i32, i32
  }
  func.func @transform_4(%arg0: i32, %arg1: i32) -> (i32, i32) {
    %c0_i32 = arith.constant 0 : i32
    %c0_i32_0 = arith.constant 0 : i32
    return %arg0, %c0_i32 : i32, i32
  }
}

</mosaic_0001>

<bundles_post_ra>
// kernel: tpu_custom_call.1
= control target key start
LH: loop header
LB: loop body
LE: loop exit
PB: predicated region body
PF: predicated region fallthrough
CT: control target
= control target key end

     0   :  { %9 = vsyncpa [#allocation5], 0  ;;  %s1906_s0 = inlined_call_operand.hbm [shape: bf16[128,128], index: 0, kind: input, shape index: {}]   ;;  %s1907_s1 = inlined_call_operand.hbm [shape: bf16[128,128], index: 1, kind: input, shape index: {}]   ;;  %s1908_s2 = inlined_call_operand.hbm [shape: s8[128,128], index: 2, kind: input, shape index: {}]   ;;  %s1909_s3 = inlined_call_operand.hbm [shape: bf16[256,128], index: 3, kind: input, shape index: {}]   ;;  %s1910_s4 = inlined_call_operand.hbm [shape: f32[128,128], index: 4, kind: output, shape index: {}]  }
   0x1   :  { %10 = vsyncpa [#allocation8], 0 }
   0x2   :  { %12 = vsyncpa [#allocation8 + $0x1], 0 }
   0x3   :  { %13 = vsyncpa [#allocation11], 0 }
   0x4   :  { %14 = vsyncpa [#allocation6], 0 }
   0x5   :  { %16 = vsyncpa [#allocation6 + $0x1], 0  ;;  %s1621_s15 = smov 0   ;;  %s1623_s16 = smov 0  }
   0x6   :  { %s1625_s17 = smov 0   ;;  %s1627_s18 = smov 0  }
   0x7   :  { %s1629_s19 = smov 0   ;;  %s1631_s20 = smov 0  }
   0x8 LB: > { %s34_s21 = sadd.s32 1, %s1578_s19  ;;  %s62_s22 = sadd.s32 1, %s1570_s17  ;;  %s1582_s20 = sphi %s1631_s20, %s22_s20   ;;  %s1578_s19 = sphi %s1629_s19, %s1936_s19   ;;  %s1574_s18 = sphi %s1627_s18, %s1935_s18   ;;  %s1570_s17 = sphi %s1625_s17, %s1934_s17   ;;  %s1566_s16 = sphi %s1623_s16, %s1933_s16   ;;  %s1562_s15 = sphi %s1621_s15, %s1932_s15  }
   0x9   : > { %p36_p0 = scmp.ge.s32.totalorder %s34_s21, 2  ;;  %p69_p1 = scmp.ne.s32.totalorder %s1570_s17, %s1566_s16 }
   0xa   : > { %p70_p2 = scmp.eq.s32.totalorder %s1582_s20, 0  ;;  %p1255_p6 = scmp.lt.s32.totalorder %s1582_s20, 2 }
   0xb   : > { %s1938_s21 = smov (%p36_p0, %s34_s21), 0  ;;  %s200_s25 = sand.u32 1, %s1582_s20  }
   0xc   : > { %p1661_p3 = por %p70_p2, %p69_p1  ;;  %s59_s24 = ssub.s32 %s1578_s19, %s1938_s21 }
   0xd   : > { %p60_p5 = scmp.eq.s32.totalorder %s59_s24, 0  ;;  %s202_s26 = sand.u32 1, %s1570_s17  }
   0xe   : > { %s1077_s28 = sshll.u32 %s202_s26, 5  ;;  %s1134_s29 = sshll.u32 %s1578_s19, 9 }
   0xf   : > { %s1672_s27 = scalar_select %p60_p5, %s1570_s17, %s62_s22  }
  0x10   : > { %s210_s6 = scalar_lea.hbm %s1907_s1, %s1134_s29  ;;  %s204_s7 = scalar_lea.vmem [#allocation7], %s1077_s28 }
  0x11   : > { %s211_s8 = sshll.u32 %s204_s7, 4  ;;  %p1680_p7 = pnand %p1255_p6, %p1661_p3  ;;  %s212_s8 = int_to_ptr.vmem [resolvable:$true] %s211_s8 }
  0x12   : > { %s1684_s10 = sshll.u32 %s202_s26, 4  ;;  %s1686_s11 = scalar_lea.sflag [#allocation8], %s200_s25 }
  0x13   : > { %p1914_p8 = pneg %p1680_p7  ;;  %s1399_s12 = scalar_lea.vmem %s212_s8, 512 }
  0x14   : > { %p1400_p9 = scmp.ne.s32.totalorder %s212_s8, %s1399_s12  ;;  %s1584_s13 = smov [#allocation7]  }
  0x15   : > { %s1404_s14 = sshll.u32 %s1584_s13, 4  ;;  %s1405_s14 = int_to_ptr.vmem [resolvable:$false] %s1404_s14 }
  0x16   : > { %p1402_p10 = pnand %p1400_p9, %p1914_p8  ;;  %s1406_s22 = scalar_lea.vmem %s1405_s14, 1024 }
  0x17   : > { %p1407_p12 = scmp.lt.s32.totalorder %s212_s8, %s1405_s14  ;;  %p1408_p13 = scmp.lt.s32.totalorder %s1406_s22, %s1399_s12 }
  0x18   : > { %p1403_p11 = pneg %p1402_p10 }
  0x19   : > { %p1409_p0 = por %p1408_p13, %p1407_p12 }
  0x1b   : > { %p1410_p2 = pnand %p1409_p0, %p1403_p11 }
  0x1d   : > { %1413 = shalt.err (!%p1410_p2)
}
  0x1e   : > { %s1911_s23 = smov 64   ;;  %s1586_s24 = smov 4  }
  0x1f   : > { %1245 = dma.hbm_to_vmem [thread:$0]  (!%p1680_p7), %s210_s6, 512, %s212_s8, %s1686_s11, %s1911_s23, %s1911_s23, %s1586_s24  }
  0x20   : > { %s1700_s25 = sadd.s32 4294967295, %s1582_s20   ;;  %s1072_s26 = sadd.s32 4294967294, %s1582_s20  }
  0x21   : > { %p75_p3 = scmp.ne.s32.totalorder %s1566_s16, %s1562_s15  ;;  %p1913_p5 = scmp.eq.s32.totalorder %s1700_s25, 0 }
  0x22   : > { %p148_p6 = scmp.eq.s32.totalorder %s1700_s25, 1  ;;  %p154_p9 = scmp.eq.s32.totalorder %s1072_s26, 1 }
  0x23   : > { %p1709_p10 = por %p1913_p5, %p75_p3  ;;  %p1073_p11 = scmp.ge.s32.totalorder %s1582_s20, 1 }
  0x24   : > { %p1717_p12 = por %p148_p6, %p69_p1  ;;  %p1721_p13 = por %p154_p9, %p75_p3 }
  0x25   : > { %p161_p0 = scmp.lt.s32.totalorder %s1582_s20, 3  ;;  %s1587_s6 = smov [#allocation4]  }
  0x26   : > { %s1919_s29 = scalar_select %p1717_p12, 1, 0 }
  0x27   : > { %s1920_s30 = scalar_select %p1721_p13, 1, 0 }
  0x28   : > { %p1726_p2 = pnand %p1073_p11, %p161_p0  ;;  %s173_s7 = sshll.u32 %s1587_s6, 4  ;;  %s174_s7 = int_to_ptr.vmem [resolvable:$true] %s173_s7 }
  0x29   : > { %s225_s8 = scalar_lea.vmem [#allocation9], %s1684_s10  ;;  %s1588_s13 = smov [#allocation10]  }
  0x2a   : > { %s233_s12 = sshll.u32 %s225_s8, 4  ;;  %s186_s14 = sshll.u32 %s1588_s13, 4  ;;  %s187_s14 = int_to_ptr.vmem [resolvable:$true] %s186_s14  ;;  %s1740_s12 = int_to_ptr.vmem [resolvable:$true] %s233_s12 }
  0x2b   : > { %p1235_p1 = pneg %p1726_p2  ;;  %s1135_s22 = sshll.u32 %s1578_s19, 8 }
  0x2c   : > { %s1745_s10 = scalar_lea.hbm %s1908_s2, %s1135_s22  ;;  %s1425_s8 = scalar_lea.vmem %s174_s7, 1024 }
  0x2d   : > { %p1736_p3 = pnand %p1235_p1, %p1913_p5  ;;  %p1426_p9 = scmp.ne.s32.totalorder %s174_s7, %s1425_s8 }
  0x2e   : > { %p1433_p1 = scmp.lt.s32.totalorder %s174_s7, %s174_s7  ;;  %p1434_p4 = scmp.lt.s32.totalorder %s1425_s8, %s1425_s8 }
  0x2f   : > { %p1416_p6 = pneg %p1736_p3 }
  0x30   : > { %p1435_p5 = por %p1434_p4, %p1433_p1 }
  0x31   : > { %p1428_p11 = pnand %p1426_p9, %p1416_p6 }
  0x33   : > { %p1429_p0 = pneg %p1428_p11 }
  0x35   : > { %p1436_p8 = pnand %p1435_p5, %p1429_p0 }
  0x37   : > { %1439 = shalt.err (!%p1436_p8)
}
  0x38   : > { %s1923_s13 = smov 64   ;;  %s1451_s6 = scalar_lea.vmem %s187_s14, 2048 }
  0x39   : > { %1238 = dma.hbm_to_vmem [thread:$0]  (!%p1736_p3), %s1906_s0, 1024, %s174_s7, [#allocation5], %s1923_s13, %s1923_s13, %s1586_s24  }
  0x3a   : > { %p1452_p13 = scmp.ne.s32.totalorder %s187_s14, %s1451_s6  ;;  %p1459_p12 = scmp.lt.s32.totalorder %s187_s14, %s187_s14 }
  0x3b   : > { %p1460_p4 = scmp.lt.s32.totalorder %s1451_s6, %s1451_s6 }
  0x3c   : > { %p1454_p9 = pnand %p1452_p13, %p1416_p6 }
  0x3d   : > { %p1461_p5 = por %p1460_p4, %p1459_p12 }
  0x3e   : > { %p1455_p11 = pneg %p1454_p9 }
  0x40   : > { %p1462_p8 = pnand %p1461_p5, %p1455_p11 }
  0x42   : > { %1465 = shalt.err (!%p1462_p8)
}
  0x43   : > { %1241 = dma.hbm_to_vmem [thread:$0]  (!%p1736_p3), %s1909_s3, 2048, %s187_s14, [#allocation11], %s1923_s13, %s1923_s13, %s1586_s24  }
  0x44   : > { %s1479_s7 = scalar_lea.vmem %s1740_s12, 256  ;;  %p1924_p6 = pneg %p1680_p7 }
  0x45   : > { %p1480_p13 = scmp.ne.s32.totalorder %s1740_s12, %s1479_s7  ;;  %s1589_s22 = smov [#allocation9]  }
  0x46   : > { %s1484_s6 = sshll.u32 %s1589_s22, 4  ;;  %s1485_s6 = int_to_ptr.vmem [resolvable:$false] %s1484_s6 }
  0x47   : > { %p1482_p12 = pnand %p1480_p13, %p1924_p6  ;;  %s1486_s26 = scalar_lea.vmem %s1485_s6, 512 }
  0x48   : > { %p1487_p1 = scmp.lt.s32.totalorder %s1740_s12, %s1485_s6  ;;  %p1488_p9 = scmp.lt.s32.totalorder %s1486_s26, %s1479_s7 }
  0x49   : > { %p1483_p0 = pneg %p1482_p12 }
  0x4a   : > { %p1489_p11 = por %p1488_p9, %p1487_p1 }
  0x4c   : > { %p1490_p4 = pnand %p1489_p11, %p1483_p0 }
  0x4e   : > { %1493 = shalt.err (!%p1490_p4)
}
  0x4f   : > { %s1590_s8 = smov 128   ;;  %s1591_s24 = smov 8  }
  0x50   : > { %1248 = dma.hbm_to_vmem [thread:$0]  (!%p1680_p7), %s1745_s10, 256, %s1740_s12, %s1686_s11, %s1590_s8, %s1590_s8, %s1591_s24  }
  0x51   : > { %245 = sbr.rel (%p1726_p2) target bundleno = 878 (0x36e), region = 36  ;;  %p1925_p3 = scmp.eq.s32.totalorder (!%p1726_p2), %s1700_s25, 0 }
  0x56   : > { %1545 = dma.done.wait (%p1925_p3), [#allocation5], 1024   ;;  %p1926_p5 = pmov %p1925_p3 }
  0x57   : > { %s251_s14 = sand.u32 1, %s1700_s25   ;;  %s1790_s13 = sand.u32 1, %s1566_s16  }
  0x58   : > { %1547 = vsyncadd (%p1926_p5), [#allocation5], 4294966272  ;;  %s1085_s23 = sshll.u32 %s1790_s13, 5  ;;  %s252_s7 = scalar_lea.sflag [#allocation8], %s251_s14 }
  0x59   : > { %s1793_s9 = scalar_lea.vmem [#allocation7], %s1085_s23 }
  0x5a   : > { %1549 = dma.done.wait (%p1709_p10), %s252_s7, 768  }
  0x5b   : > { %1551 = vsyncadd (%p1709_p10), %s252_s7, 4294966528  ;;  %s1086_s11 = sshll.u32 %s1790_s13, 4  ;;  %p1927_p7 = pmov %p1925_p3 }
  0x5c   : > { %s264_s5 = scalar_lea.vmem [#allocation9], %s1086_s11 }
  0x5d   : > { %1553 = dma.done.wait (%p1927_p7), [#allocation11], 2048   ;;  %p1928_p2 = pmov %p1925_p3 }
  0x5e   : > { %v1318_v0 = vld [vmem:[#allocation4 + $0x38] sm:$0xff]   ;;  %v1319_v1 = vld [vmem:[#allocation4 + $0x30] sm:$0xff]   ;;  %v1320_v2 = vld [vmem:[#allocation4 + $0x28] sm:$0xff]   ;;  %v1592_v22 = vmov 32   ;;  %s1088_s25 = sshll.u32 %s1790_s13, 6  ;;  %s1144_s12 = sshll.u32 %s1574_s18, 10 }
  0x5f   : > { %1555 = vsyncadd (%p1928_p2), [#allocation11], 4294965248  ;;  %1197 = vmatprep.subr.bf16.mxu0 %v1318_v0  ;;  %v1321_v3 = vld [vmem:[#allocation4 + $0x20] sm:$0xff]   ;;  %v1322_v6 = vld [vmem:[#allocation4 + $0x18] sm:$0xff]   ;;  %1317 = vset.pattern.permute.xlu1 %v1592_v22  ;;  %s1841_s28 = scalar_lea.vmem [#allocation12], %s1088_s25  ;;  %s1855_s26 = scalar_lea.hbm %s1910_s4, %s1144_s12 }
  0x60   : > { %1198 = vmatpush3.bf16.msra.mxu0 %v1318_v0  ;;  %v314_v4 = vld [vmem:[%s264_s5] sm:$0xff]  ;;  %v1324_v8 = vld [vmem:[#allocation4 + $0x8] sm:$0xff]   ;;  %v487_v19 = vld [vmem:[%s1793_s9 + $0x18] sm:$0xf]  ;;  %1316 = vset.pattern.permute.xlu0 %v1592_v22  ;;  %s944_s10 = sshll.u32 %s1841_s28, 4  ;;  %s931_s8 = scalar_lea.sflag [#allocation6], %s1790_s13  ;;  %s1857_s10 = int_to_ptr.vmem [resolvable:$true] %s944_s10 }
  0x61   : > { %1199 = vmatprep.subr.bf16.mxu0 %v1319_v1  ;;  %v316_v5 = vunpack.c.l.s8.bf16 %v314_v4  ;;  %v1323_v7 = vld [vmem:[#allocation4 + $0x10] sm:$0xff]   ;;  %v1325_v9 = vld [vmem:[#allocation4] sm:$0xff]   ;;  %v315_v10 = vld [vmem:[%s264_s5 + $0x8] sm:$0xff]  ;;  %v317_v11 = vunpack.c.h.s8.bf16 %v314_v4  ;;  %583 = vst [vmem:[#allocation3 + $0x30] sm:$0xf] %v487_v19  ;;  %v503_v41 = vunpack.c.l.bf16 %v487_v19  ;;  %s1494_s24 = scalar_lea.vmem %s1857_s10, 1024 }
  0x62   : > { %v318_v12 = vunpack.c.l.s8.bf16 %v315_v10  ;;  %v319_v13 = vunpack.c.h.s8.bf16 %v315_v10  ;;  %v483_v14 = vld [vmem:[%s1793_s9 + $0x8] sm:$0xf]  ;;  %v481_v15 = vld [vmem:[%s1793_s9] sm:$0xf]  ;;  %v484_v16 = vld [vmem:[%s1793_s9 + $0xc] sm:$0xf]  ;;  %p1495_p10 = scmp.ne.s32.totalorder %s1857_s10, %s1494_s24 }
  0x63   : > { %1213 = vmatprep.mubr.bf16.mxu0 %v316_v5  ;;  %579 = vst [vmem:[#allocation3 + $0x10] sm:$0xf] %v483_v14  ;;  %577 = vst [vmem:[#allocation3] sm:$0xf] %v481_v15  ;;  %v482_v17 = vld [vmem:[%s1793_s9 + $0x4] sm:$0xf]  ;;  %v499_v29 = vunpack.c.l.bf16 %v483_v14  ;;  %v497_v30 = vunpack.c.l.bf16 %v481_v15  ;;  %v500_v33 = vunpack.c.l.bf16 %v484_v16 }
  0x64   : > { %1200 = vmatpush3.bf16.msra.mxu0 %v1319_v1  ;;  %580 = vst [vmem:[#allocation3 + $0x18] sm:$0xf] %v484_v16  ;;  %578 = vst [vmem:[#allocation3 + $0x8] sm:$0xf] %v482_v17  ;;  %v485_v18 = vld [vmem:[%s1793_s9 + $0x10] sm:$0xf]  ;;  %v498_v36 = vunpack.c.l.bf16 %v482_v17 }
  0x65   : > { %1201 = vmatprep.subr.bf16.mxu0 %v1320_v2  ;;  %581 = vst [vmem:[#allocation3 + $0x20] sm:$0xf] %v485_v18  ;;  %v486_v20 = vld [vmem:[%s1793_s9 + $0x14] sm:$0xf]  ;;  %v488_v21 = vld [vmem:[%s1793_s9 + $0x1c] sm:$0xf]  ;;  %v501_v42 = vunpack.c.l.bf16 %v485_v18 }
  0x66   : > { %582 = vst [vmem:[#allocation3 + $0x28] sm:$0xf] %v486_v20  ;;  %584 = vst [vmem:[#allocation3 + $0x38] sm:$0xf] %v488_v21  ;;  %v1326_v23 = vld [vmem:[#allocation10 + $0x78] sm:$0xff]   ;;  %v1328_v25 = vld [vmem:[#allocation10 + $0x70] sm:$0xff]   ;;  %v502_v47 = vunpack.c.l.bf16 %v486_v20  ;;  %v504_v51 = vunpack.c.l.bf16 %v488_v21 }
  0x67   : > { %v1327_v24 = vld [vmem:[#allocation10 + $0x38] sm:$0xff]   ;;  %1157 = vmatprep.subr.bf16.mxu1 %v1326_v23  ;;  %v1329_v26 = vld [vmem:[#allocation10 + $0x30] sm:$0xff]   ;;  %v1330_v27 = vld [vmem:[#allocation10 + $0x68] sm:$0xff]   ;;  %p1929_p8 = scmp.ne.s32.totalorder %s1919_s29, 0  ;;  %s1593_s18 = smov [#allocation12]  }
  0x68   : > { %1202 = vmatpush3.bf16.msra.mxu0 %v1320_v2  ;;  %1158 = vmatpush3.bf16.msra.mxu1 %v1327_v24  ;;  %v1331_v28 = vld [vmem:[#allocation10 + $0x28] sm:$0xff]   ;;  %v1332_v48 = vld [vmem:[#allocation10 + $0x60] sm:$0xff]   ;;  %v1334_v54 = vld [vmem:[#allocation10 + $0x58] sm:$0xff]   ;;  %s1498_s14 = sshll.u32 %s1593_s18, 4  ;;  %s1499_s14 = int_to_ptr.vmem [resolvable:$false] %s1498_s14 }
  0x69   : > { %1203 = vmatprep.subr.bf16.mxu0 %v1321_v3  ;;  %1159 = vmatprep.subr.bf16.mxu1 %v1328_v25  ;;  %v1333_v50 = vld [vmem:[#allocation10 + $0x20] sm:$0xff]   ;;  %v1335_v56 = vld [vmem:[#allocation10 + $0x18] sm:$0xff]   ;;  %v1336_v59 = vld [vmem:[#allocation10 + $0x50] sm:$0xff]   ;;  %p1496_p13 = pnand %p1495_p10, %p1929_p8  ;;  %s1500_s23 = scalar_lea.vmem %s1499_s14, 2048 }
  0x6a   : > { %v1337_v61 = vld [vmem:[#allocation10 + $0x10] sm:$0xff]   ;;  %v1338_v63 = vld [vmem:[#allocation10 + $0x48] sm:$0xff]   ;;  %v1340_v2 = vld [vmem:[#allocation10 + $0x40] sm:$0xff]   ;;  %p1501_p12 = scmp.lt.s32.totalorder %s1857_s10, %s1499_s14  ;;  %p1502_p0 = scmp.lt.s32.totalorder %s1500_s23, %s1494_s24 }
  0x6b   : > { %v1339_v0 = vld [vmem:[#allocation10 + $0x8] sm:$0xff]   ;;  %v1341_v4 = vld [vmem:[#allocation10] sm:$0xff]   ;;  %p1497_p6 = pneg %p1496_p13 }
  0x6c   : > { %1204 = vmatpush3.bf16.msra.mxu0 %v1321_v3  ;;  %1160 = vmatpush3.bf16.msra.mxu1 %v1329_v26  ;;  %p1503_p1 = por %p1502_p0, %p1501_p12 }
  0x6d   : > { %1205 = vmatprep.subr.bf16.mxu0 %v1322_v6  ;;  %1161 = vmatprep.subr.bf16.mxu1 %v1330_v27 }
  0x6e   : > { %p1504_p9 = pnand %p1503_p1, %p1497_p6 }
  0x70   : > { %1206 = vmatpush3.bf16.msra.mxu0 %v1322_v6  ;;  %1162 = vmatpush3.bf16.msra.mxu1 %v1331_v28 }
  0x71   : > { %1207 = vmatprep.subr.bf16.mxu0 %v1323_v7  ;;  %1163 = vmatprep.subr.bf16.mxu1 %v1332_v48 }
  0x74   : > { %1208 = vmatpush3.bf16.msra.mxu0 %v1323_v7  ;;  %1164 = vmatpush3.bf16.msra.mxu1 %v1333_v50 }
  0x75   : > { %1209 = vmatprep.subr.bf16.mxu0 %v1324_v8  ;;  %1165 = vmatprep.subr.bf16.mxu1 %v1334_v54 }
  0x78   : > { %1210 = vmatpush3.bf16.msra.mxu0 %v1324_v8  ;;  %1166 = vmatpush3.bf16.msra.mxu1 %v1335_v56 }
  0x79   : > { %1211 = vmatprep.subr.bf16.mxu0 %v1325_v9  ;;  %1167 = vmatprep.subr.bf16.mxu1 %v1336_v59 }
  0x7c   : > { %1212 = vmatpush3.bf16.msra.mxu0 %v1325_v9  ;;  %1168 = vmatpush3.bf16.msra.mxu1 %v1337_v61 }
  0x7d   : > { %1169 = vmatprep.subr.bf16.mxu1 %v1338_v63 }
  0x7f   : > { %1214 = vmatmul.mubr.bf16.vlgmr.msra.gmra.mxu0 %v317_v11 }
  0x80   : > { %1217 = vmatprep.mubr.bf16.mxu0 %v318_v12  ;;  %1170 = vmatpush3.bf16.msra.mxu1 %v1339_v0 }
  0x81   : > { %1171 = vmatprep.subr.bf16.mxu1 %v1340_v2 }
  0x84   : > { %1172 = vmatpush3.bf16.msra.mxu1 %v1341_v4 }
  0x87   : > { %1218 = vmatmul.mubr.bf16.gmra.mxu0 %v319_v13 }
 0x13f   : > { %v1215_v31 = vpop.f32.mrf.mxu0 }
 0x140   : > { %v1812_v32 = vsub.f32 %v1215_v31, %v499_v29  ;;  %v1342_v29 = vld [vmem:[#allocation3] ss:$8 sps:$4 sm:$0xff]  }
 0x141   : > { %v431_v34 = vpop.f32.mrf.mxu0 }
 0x142   : > { %1354 = vrcp.f32 %v1812_v32  ;;  %v1815_v35 = vsub.f32 %v431_v34, %v497_v30  ;;  %v1347_v34 = vld [vmem:[#allocation3 + $0x10] ss:$8 sps:$4 sm:$0xff]  }
 0x143   : > { %v1216_v37 = vpop.f32.mrf.mxu0 }
 0x144   : > { %1356 = vrcp.f32 %v1815_v35  ;;  %v1818_v38 = vsub.f32 %v1216_v37, %v500_v33 }
 0x145   : > { %v434_v39 = vpop.f32.mrf.mxu0 }
 0x146   : > { %1358 = vrcp.f32 %v1818_v38  ;;  %v1821_v40 = vsub.f32 %v434_v39, %v498_v36  ;;  %v1350_v36 = vld [vmem:[#allocation3 + $0x20] ss:$8 sps:$4 sm:$0xff]  }
 0x147   : > { %v1219_v43 = vpop.f32.mrf.mxu0 }
 0x148   : > { %1360 = vrcp.f32 %v1821_v40  ;;  %v1824_v45 = vsub.f32 %v1219_v43, %v503_v41 }
 0x149   : > { %v447_v44 = vpop.f32.mrf.mxu0 }
 0x14a   : > { %v1826_v46 = vsub.f32 %v447_v44, %v501_v42 }
 0x14b   : > { %v1220_v49 = vpop.f32.mrf.mxu0 }
 0x14c   : > { %1362 = vrcp.f32 %v1826_v46  ;;  %v1830_v57 = vsub.f32 %v1220_v49, %v504_v51 }
 0x14d   : > { %v450_v52 = vpop.f32.mrf.mxu0  ;;  %1364 = vrcp.f32 %v1824_v45 }
 0x14e   : > { %v510_v53 = vsub.f32 %v450_v52, %v502_v47 }
 0x14f   : > { %v1355_v55 = vpop.eup %1354 }
 0x150   : > { %1366 = vrcp.f32 %v510_v53  ;;  %541 = vperm.xlu1 %1317, %v1355_v55  }
 0x151   : > { %v1357_v58 = vpop.eup %1356  ;;  %1368 = vrcp.f32 %v1830_v57 }
 0x152   : > { %531 = vperm.xlu0 %1316, %v1357_v58  }
 0x153   : > { %v1359_v60 = vpop.eup %1358 }
 0x154   : > { %546 = vperm.xlu1 %1317, %v1359_v60  }
 0x155   : > { %v1361_v62 = vpop.eup %1360 }
 0x156   : > { %536 = vperm.xlu0 %1316, %v1361_v62  }
 0x159   : > { %v1363_v1 = vpop.eup %1362 }
 0x15a   : > { %551 = vperm.xlu0 %1316, %v1363_v1   ;;  %v1365_v3 = vpop.eup %1364 }
 0x15d   : > { %v1367_v5 = vpop.eup %1366 }
 0x15e   : > { %561 = vperm.xlu0 %1316, %v1365_v3   ;;  %556 = vperm.xlu1 %1317, %v1367_v5   ;;  %v1369_v6 = vpop.eup %1368 }
 0x162   : > { %566 = vperm.xlu1 %1317, %v1369_v6  }
 0x1cb   : > { %v542_v7 = vpop.permute.xlu1 %541 }
 0x1cc   : > { %v571_v8 = vmul.f32 %v542_v7, %v1812_v32 }
 0x1cd   : > { %v532_v9 = vpop.permute.xlu0 %531 }
 0x1ce   : > { %v1138_v10 = vpack.c.bf16 %v571_v8, %v571_v8  ;;  %v569_v11 = vmul.f32 %v532_v9, %v1815_v35 }
 0x1cf   : > { %v547_v12 = vpop.permute.xlu1 %546 }
 0x1d0   : > { %619 = vst [vmem:[#allocation3 + $0x14] sm:$0xf] %v1138_v10  ;;  %v1136_v13 = vpack.c.bf16 %v569_v11, %v569_v11  ;;  %v572_v14 = vmul.f32 %v547_v12, %v1818_v38  ;;  %v1353_v38 = vld [vmem:[#allocation3 + $0x30] ss:$8 sps:$4 sm:$0xff]  }
 0x1d1   : > { %v537_v15 = vpop.permute.xlu0 %536 }
 0x1d2   : > { %617 = vst [vmem:[#allocation3 + $0x4] sm:$0xf] %v1136_v13  ;;  %v1139_v16 = vpack.c.bf16 %v572_v14, %v572_v14  ;;  %v570_v17 = vmul.f32 %v537_v15, %v1821_v40 }
 0x1d4   : > { %620 = vst [vmem:[#allocation3 + $0x1c] sm:$0xf] %v1139_v16  ;;  %v1137_v18 = vpack.c.bf16 %v570_v17, %v570_v17 }
 0x1d5   : > { %v552_v19 = vpop.permute.xlu0 %551 }
 0x1d6   : > { %618 = vst [vmem:[#allocation3 + $0xc] sm:$0xf] %v1137_v18  ;;  %v573_v20 = vmul.f32 %v552_v19, %v1826_v46 }
 0x1d8   : > { %v1140_v21 = vpack.c.bf16 %v573_v20, %v573_v20 }
 0x1d9   : > { %v562_v22 = vpop.permute.xlu0 %561  ;;  %v557_v23 = vpop.permute.xlu1 %556 }
 0x1da   : > { %621 = vst [vmem:[#allocation3 + $0x24] sm:$0xf] %v1140_v21  ;;  %v575_v24 = vmul.f32 %v562_v22, %v1824_v45  ;;  %v574_v25 = vmul.f32 %v557_v23, %v510_v53 }
 0x1db   : > { %v1345_v32 = vld [vmem:[#allocation3 + $0x14] ss:$8 sps:$4 sm:$0xff]  }
 0x1dc   : > { %v1142_v26 = vpack.c.bf16 %v575_v24, %v575_v24  ;;  %v1141_v27 = vpack.c.bf16 %v574_v25, %v574_v25 }
 0x1dd   : > { %v567_v28 = vpop.permute.xlu1 %566  ;;  %v1344_v30 = vld [vmem:[#allocation3 + $0x4] ss:$8 sps:$4 sm:$0xff]  }
 0x1de   : > { %623 = vst [vmem:[#allocation3 + $0x34] sm:$0xf] %v1142_v26  ;;  %622 = vst [vmem:[#allocation3 + $0x2c] sm:$0xf] %v1141_v27  ;;  %v576_v31 = vmul.f32 %v567_v28, %v1830_v57  ;;  %833 = vmatprep.mubr.bf16.mxu1 %v1344_v30 }
 0x1df   : > { %834 = vmatmul.mubr.bf16.vlgmr.msra.gmra.mxu1 %v1342_v29 }
 0x1e0   : > { %v1143_v33 = vpack.c.bf16 %v576_v31, %v576_v31  ;;  %841 = vmatprep.mubr.bf16.mxu1 %v1345_v32 }
 0x1e2   : > { %624 = vst [vmem:[#allocation3 + $0x3c] sm:$0xf] %v1143_v33 }
 0x1e5   : > { %v1348_v35 = vld [vmem:[#allocation3 + $0x24] ss:$8 sps:$4 sm:$0xff]  }
 0x1e7   : > { %842 = vmatmul.mubr.bf16.gmra.mxu1 %v1347_v34 }
 0x1e8   : > { %849 = vmatprep.mubr.bf16.mxu1 %v1348_v35 }
 0x1e9   : > { %v1351_v37 = vld [vmem:[#allocation3 + $0x34] ss:$8 sps:$4 sm:$0xff]  }
 0x1ef   : > { %850 = vmatmul.mubr.bf16.gmra.mxu1 %v1350_v36 }
 0x1f0   : > { %857 = vmatprep.mubr.bf16.mxu1 %v1351_v37 }
 0x1f7   : > { %858 = vmatmul.mubr.bf16.gmra.mxu1 %v1353_v38 }
 0x29f   : > { %v1173_v39 = vpop.f32.mrf.mxu1 }
 0x2a1   : > { %v1174_v40 = vpop.f32.mrf.mxu1 }
 0x2a2   : > { %v1175_v41 = vadd.f32 %v1174_v40, %v1173_v39 }
 0x2a3   : > { %v1176_v42 = vpop.f32.mrf.mxu1 }
 0x2a4   : > { %v866_v43 = vmax.f32 %v1175_v41, 0.0 }
 0x2a5   : > { %v1177_v44 = vpop.f32.mrf.mxu1 }
 0x2a6   : > { %v1178_v45 = vadd.f32 %v1177_v44, %v1176_v42  ;;  %v874_v46 = vmul.f32 %v866_v43, %v866_v43 }
 0x2a7   : > { %v1179_v47 = vpop.f32.mrf.mxu1 }
 0x2a8   : > { %v867_v48 = vmax.f32 %v1178_v45, 0.0  ;;  %882 = vadd.xlane.f32.xlu0 %v874_v46 }
 0x2a9   : > { %v1180_v49 = vpop.f32.mrf.mxu1 }
 0x2aa   : > { %v1181_v50 = vadd.f32 %v1180_v49, %v1179_v47  ;;  %v875_v51 = vmul.f32 %v867_v48, %v867_v48 }
 0x2ab   : > { %v1182_v52 = vpop.f32.mrf.mxu1 }
 0x2ac   : > { %v868_v53 = vmax.f32 %v1181_v50, 0.0  ;;  %884 = vadd.xlane.f32.xlu1 %v875_v51 }
 0x2ad   : > { %v1183_v54 = vpop.f32.mrf.mxu1 }
 0x2ae   : > { %v1184_v55 = vadd.f32 %v1183_v54, %v1182_v52  ;;  %v876_v56 = vmul.f32 %v868_v53, %v868_v53 }
 0x2af   : > { %v1185_v57 = vpop.f32.mrf.mxu1 }
 0x2b0   : > { %v869_v58 = vmax.f32 %v1184_v55, 0.0  ;;  %886 = vadd.xlane.f32.xlu0 %v876_v56 }
 0x2b1   : > { %v1186_v59 = vpop.f32.mrf.mxu1 }
 0x2b2   : > { %v1187_v60 = vadd.f32 %v1186_v59, %v1185_v57  ;;  %v877_v61 = vmul.f32 %v869_v58, %v869_v58 }
 0x2b3   : > { %v1188_v62 = vpop.f32.mrf.mxu1 }
 0x2b4   : > { %v870_v63 = vmax.f32 %v1187_v60, 0.0  ;;  %888 = vadd.xlane.f32.xlu0 %v877_v61 }
 0x2b5   : > { %v1189_v0 = vpop.f32.mrf.mxu1 }
 0x2b6   : > { %v1190_v1 = vadd.f32 %v1189_v0, %v1188_v62  ;;  %v878_v2 = vmul.f32 %v870_v63, %v870_v63 }
 0x2b7   : > { %v1191_v3 = vpop.f32.mrf.mxu1 }
 0x2b8   : > { %v871_v4 = vmax.f32 %v1190_v1, 0.0  ;;  %890 = vadd.xlane.f32.xlu1 %v878_v2 }
 0x2b9   : > { %v1192_v5 = vpop.f32.mrf.mxu1 }
 0x2ba   : > { %v1193_v6 = vadd.f32 %v1192_v5, %v1191_v3  ;;  %v879_v7 = vmul.f32 %v871_v4, %v871_v4 }
 0x2bb   : > { %v1194_v8 = vpop.f32.mrf.mxu1 }
 0x2bc   : > { %v872_v9 = vmax.f32 %v1193_v6, 0.0  ;;  %892 = vadd.xlane.f32.xlu0 %v879_v7 }
 0x2bd   : > { %v1195_v10 = vpop.f32.mrf.mxu1 }
 0x2be   : > { %v1196_v11 = vadd.f32 %v1195_v10, %v1194_v8  ;;  %v880_v12 = vmul.f32 %v872_v9, %v872_v9 }
 0x2c0   : > { %v873_v13 = vmax.f32 %v1196_v11, 0.0  ;;  %894 = vadd.xlane.f32.xlu1 %v880_v12 }
 0x2c2   : > { %v881_v14 = vmul.f32 %v873_v13, %v873_v13 }
 0x2c4   : > { %896 = vadd.xlane.f32.xlu0 %v881_v14 }
 0x331   : > { %v883_v15 = vpop.xlane.xlu0 %882 }
 0x332   : > { %v898_v16 = vmax.f32 %v883_v15, 1e-24 }
 0x334   : > { %1370 = vrsqrt.f32 %v898_v16 }
 0x335   : > { %v885_v17 = vpop.xlane.xlu1 %884 }
 0x336   : > { %v899_v18 = vmax.f32 %v885_v17, 1e-24 }
 0x338   : > { %1372 = vrsqrt.f32 %v899_v18 }
 0x339   : > { %v887_v19 = vpop.xlane.xlu0 %886 }
 0x33a   : > { %v900_v20 = vmax.f32 %v887_v19, 1e-24 }
 0x33c   : > { %1374 = vrsqrt.f32 %v900_v20 }
 0x33d   : > { %v889_v21 = vpop.xlane.xlu0 %888 }
 0x33e   : > { %v901_v22 = vmax.f32 %v889_v21, 1e-24 }
 0x340   : > { %1376 = vrsqrt.f32 %v901_v22 }
 0x341   : > { %v1371_v23 = vpop.eup %1370  ;;  %v891_v24 = vpop.xlane.xlu1 %890 }
 0x342   : > { %v914_v25 = vmul.f32 %v1371_v23, %v866_v43  ;;  %v902_v26 = vmax.f32 %v891_v24, 1e-24 }
 0x344   : > { %922 = vst [vmem:[%s1841_s28] sm:$0xff] %v914_v25  ;;  %1378 = vrsqrt.f32 %v902_v26 }
 0x345   : > { %v1373_v27 = vpop.eup %1372  ;;  %v893_v28 = vpop.xlane.xlu0 %892 }
 0x346   : > { %v915_v29 = vmul.f32 %v1373_v27, %v867_v48  ;;  %v903_v30 = vmax.f32 %v893_v28, 1e-24 }
 0x348   : > { %923 = vst [vmem:[%s1841_s28 + $0x8] sm:$0xff] %v915_v29  ;;  %1380 = vrsqrt.f32 %v903_v30 }
 0x349   : > { %v1375_v31 = vpop.eup %1374  ;;  %v895_v32 = vpop.xlane.xlu1 %894 }
 0x34a   : > { %v916_v33 = vmul.f32 %v1375_v31, %v868_v53  ;;  %v904_v34 = vmax.f32 %v895_v32, 1e-24 }
 0x34c   : > { %924 = vst [vmem:[%s1841_s28 + $0x10] sm:$0xff] %v916_v33  ;;  %1382 = vrsqrt.f32 %v904_v34 }
 0x34d   : > { %v1377_v35 = vpop.eup %1376  ;;  %v897_v36 = vpop.xlane.xlu0 %896 }
 0x34e   : > { %v917_v37 = vmul.f32 %v1377_v35, %v869_v58  ;;  %v905_v38 = vmax.f32 %v897_v36, 1e-24 }
 0x350   : > { %925 = vst [vmem:[%s1841_s28 + $0x18] sm:$0xff] %v917_v37  ;;  %1384 = vrsqrt.f32 %v905_v38 }
 0x351   : > { %v1379_v39 = vpop.eup %1378 }
 0x352   : > { %v918_v40 = vmul.f32 %v1379_v39, %v870_v63 }
 0x354   : > { %926 = vst [vmem:[%s1841_s28 + $0x20] sm:$0xff] %v918_v40 }
 0x355   : > { %v1381_v41 = vpop.eup %1380 }
 0x356   : > { %v919_v42 = vmul.f32 %v1381_v41, %v871_v4 }
 0x358   : > { %927 = vst [vmem:[%s1841_s28 + $0x28] sm:$0xff] %v919_v42 }
 0x359   : > { %v1383_v43 = vpop.eup %1382 }
 0x35a   : > { %v920_v44 = vmul.f32 %v1383_v43, %v872_v9 }
 0x35c   : > { %928 = vst [vmem:[%s1841_s28 + $0x30] sm:$0xff] %v920_v44 }
 0x35d   : > { %v1385_v45 = vpop.eup %1384 }
 0x35e   : > { %v921_v46 = vmul.f32 %v1385_v45, %v873_v13 }
 0x360   : > { %929 = vst [vmem:[%s1841_s28 + $0x38] sm:$0xff] %v921_v46 }
 0x361   : > { %1507 = shalt.err (!%p1504_p9)
}
 0x362   : > { %s1508_s7 = scalar_lea.hbm %s1855_s26, 1024  ;;  %s1512_s5 = scalar_lea.hbm %s1910_s4, 2048 }
 0x363   : > { %p1509_p11 = scmp.ne.s32.totalorder %s1855_s26, %s1508_s7  ;;  %p1513_p5 = scmp.lt.s32.totalorder %s1855_s26, %s1910_s4 }
 0x364   : > { %p1514_p7 = scmp.lt.s32.totalorder %s1512_s5, %s1508_s7 }
 0x365   : > { %p1510_p4 = pnand %p1509_p11, %p1929_p8 }
 0x366   : > { %p1515_p2 = por %p1514_p7, %p1513_p5 }
 0x367   : > { %p1511_p3 = pneg %p1510_p4 }
 0x369   : > { %p1516_p10 = pnand %p1515_p2, %p1511_p3 }
 0x36b   : > { %1519 = shalt.err (!%p1516_p10)
}
 0x36c   : > { %s1594_s12 = smov 128   ;;  %s1595_s22 = smov 8  }
 0x36d   : > { %1233 = dma.vmem_to_hbm [thread:$0]  (%p1929_p8), %s1857_s10, 1024, %s1855_s26, %s931_s8, %s1594_s12, %s1594_s12, %s1595_s22  }
 0x36e PF: > { %s959_s6 = sand.u32 1, %s1562_s15   ;;  %p1930_p13 = scmp.ne.s32.totalorder %s1920_s30, 0 }
 0x36f   : > { %p1931_p6 = scmp.ge.s32.totalorder %s1582_s20, 2  ;;  %s960_s24 = scalar_lea.sflag [#allocation6], %s959_s6 }
 0x371   : > { %p1250_p12 = pnand %p1931_p6, %p1930_p13 }
 0x373   : > { %p1251_p0 = pneg %p1250_p12 }
 0x375   : > { %1557 = dma.done.wait (%p1251_p0), %s960_s24, 1024  }
 0x376   : > { %1559 = vsyncadd (%p1251_p0), %s960_s24, 4294966272  ;;  %s22_s20 = sadd.s32 1, %s1582_s20   ;;  %s1932_s15 = smov %s1566_s16 }
 0x377   : > { %p19_p1 = scmp.ge.s32.totalorder %s22_s20, 4   ;;  %s1933_s16 = smov %s1570_s17 }
 0x378   : > { %s1934_s17 = smov %s1672_s27  ;;  %s1935_s18 = smov %s1578_s19 }
 0x379   : > { %s1936_s19 = smov %s1938_s21  ;;  %21 = sbr.rel (!%p19_p1) target bundleno = 8 (0x8), region = 110 }
 0x37e   :  { %965 = vsyncpa [#allocation5], 1 }
 0x37f   :  { %967 = vsyncpa [#allocation5 + $0x1], 1 }
 0x380   :  { %968 = vsyncpa [#allocation8], 1 }
 0x381   :  { %970 = vsyncpa [#allocation8 + $0x1], 1 }
 0x382   :  { %971 = vsyncpa [#allocation11], 1 }
 0x383   :  { %972 = vsyncpa [#allocation6], 1 }
 0x384   :  { %974 = vsyncpa [#allocation6 + $0x1], 1 }

</bundles_post_ra>
